<compile_context>
chip_gen: v6e
topology: v6e:2x2x1
jax: 0.10.0
libtpu: 0.0.40
codegen_flags: <defaults>
</compile_context>

<pallas_src>
import functools

import jax
import jax.numpy as jnp
from jax import lax
from jax.experimental import pallas as pl
from jax.experimental.pallas import tpu as pltpu


_NCORES = 2                       # "parallel" grid axis; 2 TCs on v7x, serial elsewhere
_LANE = 128
_TARGET_BLOCK_BYTES = 2 * 1024 * 1024
_MAX_TILE_ROWS = 8192


def _pretrain_loss_kernel(xr_ref, xo_ref, m_ref, z1_ref, z2_ref, out_ref, acc_ref, *,
                          sub_d, groups, tile_rows, tiles_per_core, rows_total,
                          need_row_mask, overlap):
    i = pl.program_id(1)

    # ---- init per-core scalar accumulators ---------------------------------
    @pl.when(i == 0)
    def _init():
        acc_ref[0] = jnp.float32(0.0)   # sum(mask * (x_recon - x_orig)^2)
        acc_ref[1] = jnp.float32(0.0)   # sum(mask)

    # ---- hot streamed part: cast on the tile, fold mask into the sum -------
    xr = xr_ref[...].astype(jnp.float32)
    xo = xo_ref[...].astype(jnp.float32)
    m = m_ref[...].astype(jnp.float32)            # (tile_rows, groups)
    diff = xr - xo
    sq = diff * diff                              # (tile_rows, groups * sub_d)

    if need_row_mask:
        # Ragged / clamped tiles: zero out rows past the real row count.
        base = (pl.program_id(0) * tiles_per_core + i) * tile_rows
        row_ids = base + lax.broadcasted_iota(jnp.int32, (tile_rows, 1), 0)
        valid = row_ids < rows_total
        sq = jnp.where(valid, sq, 0.0)
        m = jnp.where(valid, m, 0.0)

    tile_sum = jnp.float32(0.0)
    for g in range(groups):                       # static, small (1..16)
        tile_sum = tile_sum + jnp.sum(
            sq[:, g * sub_d:(g + 1) * sub_d] * m[:, g:g + 1])
    acc_ref[0] += tile_sum
    acc_ref[1] += jnp.sum(m)

    # ---- finalize: tiny cosine branch once, emit per-core partials ---------
    @pl.when(i == tiles_per_core - 1)
    def _finalize():
        z1 = z1_ref[...].astype(jnp.float32)      # (B*C, T, W)
        z2 = z2_ref[...].astype(jnp.float32)
        w = z1.shape[-1]
        a = z1[:, :, w - overlap:]                # (B*C, T, ov)
        b = z2[:, :, :overlap]
        dots = jnp.sum(a * b, axis=1)             # reduce over T -> (B*C, ov)
        n1 = jnp.sum(a * a, axis=1)
        n2 = jnp.sum(b * b, axis=1)
        eps2 = jnp.float32(1e-8) * jnp.float32(1e-8)
        cos = (dots
               * lax.rsqrt(jnp.maximum(n1, eps2))
               * lax.rsqrt(jnp.maximum(n2, eps2)))
        cos_sum = jnp.sum(cos)

        # Pack the three partial scalars into sublanes 0/1/2 of the output block.
        row = lax.broadcasted_iota(jnp.int32, out_ref.shape, 1)
        out_ref[...] = jnp.where(
            row == 0, acc_ref[0],
            jnp.where(row == 1, acc_ref[1], cos_sum)).astype(jnp.float32)


def pretrain_loss(x_recon, x_orig, mask, latent1, latent2, alpha: float = 0.2):
    """JAX/Pallas equivalent of PretrainLoss.forward."""
    B, N, D = x_recon.shape
    rows = B * N

    # lane-dense packing of the streamed recon arrays (free contiguous reshape)
    if D < _LANE and _LANE % D == 0 and rows % (_LANE // D) == 0:
        groups = _LANE // D
    else:
        groups = 1
    lane_w = groups * D
    rows_p = rows // groups

    xr2 = x_recon.reshape(rows_p, lane_w)         # native dtype, no upcast
    xo2 = x_orig.reshape(rows_p, lane_w)
    m2 = mask.astype(jnp.float32).reshape(rows_p, groups)   # tiny stream

    Bl, C, T, W = latent1.shape
    ov = W // 2
    z1 = latent1.reshape(Bl * C, T, W)            # no transpose: reduce over T in-kernel
    z2 = latent2.reshape(Bl * C, T, W)

    # tile sizing: ~2 MiB per streamed block, rows multiple of 8 (or the full extent)
    itemsize = jnp.dtype(x_recon.dtype).itemsize
    tile = _TARGET_BLOCK_BYTES // max(1, lane_w * itemsize)
    tile = int(min(rows_p, tile, _MAX_TILE_ROWS))
    if tile < rows_p:
        tile = max(8, (tile // 8) * 8)
    tile = max(1, tile)
    n_tiles = -(-rows_p // tile)
    tpc = -(-n_tiles // _NCORES)                  # tiles per core
    need_row_mask = (_NCORES * tpc * tile != rows_p)

    def row_map(c, i):
        # clamp so padded grid steps re-read a valid block (masked out in-kernel)
        return (jnp.minimum(c * tpc + i, n_tiles - 1), 0)

    kernel = functools.partial(
        _pretrain_loss_kernel,
        sub_d=D, groups=groups, tile_rows=tile, tiles_per_core=tpc,
        rows_total=rows_p, need_row_mask=need_row_mask, overlap=ov)

    partials = pl.pallas_call(
        kernel,
        out_shape=jax.ShapeDtypeStruct((_NCORES, 8, _LANE), jnp.float32),
        grid_spec=pltpu.PrefetchScalarGridSpec(
            num_scalar_prefetch=0,
            grid=(_NCORES, tpc),
            in_specs=[
                pl.BlockSpec((tile, lane_w), row_map),                    # x_recon
                pl.BlockSpec((tile, lane_w), row_map),                    # x_orig
                pl.BlockSpec((tile, groups), row_map),                    # mask (packed)
                pl.BlockSpec((Bl * C, T, W), lambda c, i: (0, 0, 0)),     # latent1 (resident)
                pl.BlockSpec((Bl * C, T, W), lambda c, i: (0, 0, 0)),     # latent2 (resident)
            ],
            out_specs=pl.BlockSpec((1, 8, _LANE), lambda c, i: (c, 0, 0)),
            scratch_shapes=[pltpu.SMEM((2,), jnp.float32)],
        ),
        compiler_params=pltpu.CompilerParams(
            dimension_semantics=("parallel", "arbitrary"),
            vmem_limit_bytes=32 * 1024 * 1024),
    )(xr2, xo2, m2, z1, z2)

    # combine per-core partials (tiny scalar math; exact divides done once here)
    recon_num = partials[:, 0, 0].sum()
    mask_sum = partials[:, 1, 0].sum()
    cos_sum = partials[0, 2, 0]

    recon_loss = recon_num / (jnp.float32(D) * mask_sum)
    emb_loss = 1.0 - cos_sum / jnp.float32(Bl * C * ov)
    return (1.0 - alpha) * recon_loss + alpha * emb_loss


def _reference(x_recon, x_orig, mask, latent1, latent2, alpha=0.2):
    # Pure-JAX reference mirroring the PyTorch semantics.
    loss = (x_recon - x_orig) ** 2
    loss = loss.mean(axis=-1)
    recon = (loss * mask).sum() / mask.sum()

    ov = latent1.shape[-1] // 2
    z1 = jnp.swapaxes(latent1[:, :, :, -ov:], 2, 3)
    z2 = jnp.swapaxes(latent2[:, :, :, :ov], 2, 3)
    eps = 1e-8
    dot = jnp.sum(z1 * z2, axis=-1)
    n1 = jnp.maximum(jnp.linalg.norm(z1, axis=-1), eps)
    n2 = jnp.maximum(jnp.linalg.norm(z2, axis=-1), eps)
    emb = 1.0 - jnp.mean(dot / (n1 * n2))
    return (1.0 - alpha) * recon + alpha * emb


if __name__ == "__main__":
    key = jax.random.PRNGKey(0)
    k1, k2, k3, k4, k5 = jax.random.split(key, 5)

    B, N, D = 2, 8, 32          # patches
    C, T, W = 4, 8, 16          # latent: (B, C, T, W), overlap = W // 2

    x_recon = jax.random.normal(k1, (B, N, D), dtype=jnp.float32)
    x_orig = jax.random.normal(k2, (B, N, D), dtype=jnp.float32)
    mask = jax.random.bernoulli(k3, 0.5, (B, N)).astype(jnp.float32)
    mask = mask.at[0, 0].set(1.0)  # guarantee mask.sum() > 0
    latent1 = jax.random.normal(k4, (B, C, T, W), dtype=jnp.float32)
    latent2 = jax.random.normal(k5, (B, C, T, W), dtype=jnp.float32)

    out = pretrain_loss(x_recon, x_orig, mask, latent1, latent2, alpha=0.2)
    out = jax.block_until_ready(out)

    ref = _reference(x_recon, x_orig, mask, latent1, latent2, alpha=0.2)
    assert jnp.allclose(out, ref, atol=1e-4, rtol=1e-4), (out, ref)

    print("KERNEL_OK")
</pallas_src>

<mosaic_0001>
module attributes {stable_mosaic.version = 11 : i64} {
  func.func @_pretrain_loss_kernel(%arg0: i32, %arg1: i32, %arg2: memref<4x128xf32, #tpu.memory_space<vmem>>, %arg3: memref<4x128xf32, #tpu.memory_space<vmem>>, %arg4: memref<4x4xf32, #tpu.memory_space<vmem>>, %arg5: memref<8x8x16xf32, #tpu.memory_space<vmem>>, %arg6: memref<8x8x16xf32, #tpu.memory_space<vmem>>, %arg7: memref<1x8x128xf32, #tpu.memory_space<vmem>>, %arg8: memref<2xf32, #tpu.memory_space<smem>>) attributes {dimension_semantics = [#tpu.dimension_semantics<parallel>, #tpu.dimension_semantics<arbitrary>], iteration_bounds = array<i64: 2, 1>, scalar_prefetch = 0 : i64, scratch_operands = 1 : i64, tpu.core_type = #tpu.core_type<tc>, window_params = [{transform_indices = @transform_0, window_bounds = array<i64: 4, 128>}, {transform_indices = @transform_1, window_bounds = array<i64: 4, 128>}, {transform_indices = @transform_2, window_bounds = array<i64: 4, 4>}, {pipeline_mode = #tpu.pipeline_mode<synchronous>, transform_indices = @transform_3, window_bounds = array<i64: 8, 8, 16>}, {pipeline_mode = #tpu.pipeline_mode<synchronous>, transform_indices = @transform_4, window_bounds = array<i64: 8, 8, 16>}, {transform_indices = @transform_5, window_bounds = array<i64: 1, 8, 128>}]} {
    %c0_i32 = arith.constant 0 : i32
    %0 = arith.cmpi eq, %arg1, %c0_i32 : i32
    %1 = arith.extui %0 : i1 to i32
    %c0_i32_0 = arith.constant 0 : i32
    %2 = arith.cmpi ne, %1, %c0_i32_0 : i32
    scf.if %2 {
      %cst_19 = arith.constant 0.000000e+00 : f32
      %c0_20 = arith.constant 0 : index
      %73 = memref.load %arg8[%c0_20] : memref<2xf32, #tpu.memory_space<smem>>
      memref.store %cst_19, %arg8[%c0_20] : memref<2xf32, #tpu.memory_space<smem>>
      %cst_21 = arith.constant 0.000000e+00 : f32
      %c1_22 = arith.constant 1 : index
      %74 = memref.load %arg8[%c1_22] : memref<2xf32, #tpu.memory_space<smem>>
      memref.store %cst_21, %arg8[%c1_22] : memref<2xf32, #tpu.memory_space<smem>>
    } else {
    }
    %c0 = arith.constant 0 : index
    %c0_1 = arith.constant 0 : index
    %3 = vector.load %arg2[%c0, %c0_1] : memref<4x128xf32, #tpu.memory_space<vmem>>, vector<4x128xf32>
    %c0_2 = arith.constant 0 : index
    %c0_3 = arith.constant 0 : index
    %4 = vector.load %arg3[%c0_2, %c0_3] : memref<4x128xf32, #tpu.memory_space<vmem>>, vector<4x128xf32>
    %c0_4 = arith.constant 0 : index
    %c0_5 = arith.constant 0 : index
    %5 = vector.load %arg4[%c0_4, %c0_5] : memref<4x4xf32, #tpu.memory_space<vmem>>, vector<4x4xf32>
    %6 = arith.subf %3, %4 : vector<4x128xf32>
    %7 = arith.mulf %6, %6 : vector<4x128xf32>
    %c1_i32 = arith.constant 1 : i32
    %8 = arith.muli %arg0, %c1_i32 : i32
    %9 = arith.addi %8, %arg1 : i32
    %c4_i32 = arith.constant 4 : i32
    %10 = arith.muli %9, %c4_i32 : i32
    %11 = tpu.iota {dimensions = array<i32: 0>} : vector<4x1xi32>
    %12 = vector.broadcast %10 : i32 to vector<4x1xi32>
    %13 = arith.addi %12, %11 : vector<4x1xi32>
    %c4_i32_6 = arith.constant 4 : i32
    %14 = vector.broadcast %c4_i32_6 : i32 to vector<4x1xi32>
    %15 = arith.cmpi slt, %13, %14 : vector<4x1xi32>
    %cst = arith.constant 0.000000e+00 : f32
    %16 = vector.shape_cast %15 : vector<4x1xi1> to vector<4x1xi1>
    %17 = vector.broadcast %16 : vector<4x1xi1> to vector<4x128xi1>
    %18 = vector.broadcast %cst : f32 to vector<4x128xf32>
    %19 = arith.select %17, %7, %18 : vector<4x128xi1>, vector<4x128xf32>
    %cst_7 = arith.constant 0.000000e+00 : f32
    %20 = vector.shape_cast %15 : vector<4x1xi1> to vector<4x1xi1>
    %21 = vector.broadcast %20 : vector<4x1xi1> to vector<4x4xi1>
    %22 = vector.broadcast %cst_7 : f32 to vector<4x4xf32>
    %23 = arith.select %21, %5, %22 : vector<4x4xi1>, vector<4x4xf32>
    %24 = vector.extract_strided_slice %19 {offsets = [0, 0], sizes = [4, 32], strides = [1, 1]} : vector<4x128xf32> to vector<4x32xf32>
    %25 = vector.extract_strided_slice %23 {offsets = [0, 0], sizes = [4, 1], strides = [1, 1]} : vector<4x4xf32> to vector<4x1xf32>
    %26 = vector.broadcast %25 : vector<4x1xf32> to vector<4x32xf32>
    %27 = arith.mulf %24, %26 : vector<4x32xf32>
    %28 = vector.shape_cast %27 : vector<4x32xf32> to vector<1x4x32xf32>
    %cst_8 = arith.constant dense<0.000000e+00> : vector<1xf32>
    %29 = vector.multi_reduction <add>, %28, %cst_8 [1, 2] : vector<1x4x32xf32> to vector<1xf32>
    %30 = vector.shape_cast %29 : vector<1xf32> to vector<1x1x1xf32>
    %31 = vector.extract %30[0, 0, 0] : f32 from vector<1x1x1xf32>
    %cst_9 = arith.constant 0.000000e+00 : f32
    %32 = arith.addf %cst_9, %31 : f32
    %33 = vector.extract_strided_slice %19 {offsets = [0, 32], sizes = [4, 32], strides = [1, 1]} : vector<4x128xf32> to vector<4x32xf32>
    %34 = vector.extract_strided_slice %23 {offsets = [0, 1], sizes = [4, 1], strides = [1, 1]} : vector<4x4xf32> to vector<4x1xf32>
    %35 = vector.broadcast %34 : vector<4x1xf32> to vector<4x32xf32>
    %36 = arith.mulf %33, %35 : vector<4x32xf32>
    %37 = vector.shape_cast %36 : vector<4x32xf32> to vector<1x4x32xf32>
    %cst_10 = arith.constant dense<0.000000e+00> : vector<1xf32>
    %38 = vector.multi_reduction <add>, %37, %cst_10 [1, 2] : vector<1x4x32xf32> to vector<1xf32>
    %39 = vector.shape_cast %38 : vector<1xf32> to vector<1x1x1xf32>
    %40 = vector.extract %39[0, 0, 0] : f32 from vector<1x1x1xf32>
    %41 = arith.addf %32, %40 : f32
    %42 = vector.extract_strided_slice %19 {offsets = [0, 64], sizes = [4, 32], strides = [1, 1]} : vector<4x128xf32> to vector<4x32xf32>
    %43 = vector.extract_strided_slice %23 {offsets = [0, 2], sizes = [4, 1], strides = [1, 1]} : vector<4x4xf32> to vector<4x1xf32>
    %44 = vector.broadcast %43 : vector<4x1xf32> to vector<4x32xf32>
    %45 = arith.mulf %42, %44 : vector<4x32xf32>
    %46 = vector.shape_cast %45 : vector<4x32xf32> to vector<1x4x32xf32>
    %cst_11 = arith.constant dense<0.000000e+00> : vector<1xf32>
    %47 = vector.multi_reduction <add>, %46, %cst_11 [1, 2] : vector<1x4x32xf32> to vector<1xf32>
    %48 = vector.shape_cast %47 : vector<1xf32> to vector<1x1x1xf32>
    %49 = vector.extract %48[0, 0, 0] : f32 from vector<1x1x1xf32>
    %50 = arith.addf %41, %49 : f32
    %51 = vector.extract_strided_slice %19 {offsets = [0, 96], sizes = [4, 32], strides = [1, 1]} : vector<4x128xf32> to vector<4x32xf32>
    %52 = vector.extract_strided_slice %23 {offsets = [0, 3], sizes = [4, 1], strides = [1, 1]} : vector<4x4xf32> to vector<4x1xf32>
    %53 = vector.broadcast %52 : vector<4x1xf32> to vector<4x32xf32>
    %54 = arith.mulf %51, %53 : vector<4x32xf32>
    %55 = vector.shape_cast %54 : vector<4x32xf32> to vector<1x4x32xf32>
    %cst_12 = arith.constant dense<0.000000e+00> : vector<1xf32>
    %56 = vector.multi_reduction <add>, %55, %cst_12 [1, 2] : vector<1x4x32xf32> to vector<1xf32>
    %57 = vector.shape_cast %56 : vector<1xf32> to vector<1x1x1xf32>
    %58 = vector.extract %57[0, 0, 0] : f32 from vector<1x1x1xf32>
    %59 = arith.addf %50, %58 : f32
    %c0_13 = arith.constant 0 : index
    %60 = memref.load %arg8[%c0_13] : memref<2xf32, #tpu.memory_space<smem>>
    %61 = arith.addf %60, %59 : f32
    %c0_14 = arith.constant 0 : index
    %62 = memref.load %arg8[%c0_14] : memref<2xf32, #tpu.memory_space<smem>>
    memref.store %61, %arg8[%c0_14] : memref<2xf32, #tpu.memory_space<smem>>
    %c1 = arith.constant 1 : index
    %63 = memref.load %arg8[%c1] : memref<2xf32, #tpu.memory_space<smem>>
    %64 = vector.shape_cast %23 : vector<4x4xf32> to vector<1x4x4xf32>
    %cst_15 = arith.constant dense<0.000000e+00> : vector<1xf32>
    %65 = vector.multi_reduction <add>, %64, %cst_15 [1, 2] : vector<1x4x4xf32> to vector<1xf32>
    %66 = vector.shape_cast %65 : vector<1xf32> to vector<1x1x1xf32>
    %67 = vector.extract %66[0, 0, 0] : f32 from vector<1x1x1xf32>
    %68 = arith.addf %63, %67 : f32
    %c1_16 = arith.constant 1 : index
    %69 = memref.load %arg8[%c1_16] : memref<2xf32, #tpu.memory_space<smem>>
    memref.store %68, %arg8[%c1_16] : memref<2xf32, #tpu.memory_space<smem>>
    %c0_i32_17 = arith.constant 0 : i32
    %70 = arith.cmpi eq, %arg1, %c0_i32_17 : i32
    %71 = arith.extui %70 : i1 to i32
    %c0_i32_18 = arith.constant 0 : i32
    %72 = arith.cmpi ne, %71, %c0_i32_18 : i32
    scf.if %72 {
      %c0_19 = arith.constant 0 : index
      %c0_20 = arith.constant 0 : index
      %c0_21 = arith.constant 0 : index
      %73 = vector.load %arg5[%c0_19, %c0_20, %c0_21] : memref<8x8x16xf32, #tpu.memory_space<vmem>>, vector<8x8x16xf32>
      %c0_22 = arith.constant 0 : index
      %c0_23 = arith.constant 0 : index
      %c0_24 = arith.constant 0 : index
      %74 = vector.load %arg6[%c0_22, %c0_23, %c0_24] : memref<8x8x16xf32, #tpu.memory_space<vmem>>, vector<8x8x16xf32>
      %75 = vector.extract_strided_slice %73 {offsets = [0, 0, 8], sizes = [8, 8, 8], strides = [1, 1, 1]} : vector<8x8x16xf32> to vector<8x8x8xf32>
      %76 = vector.extract_strided_slice %74 {offsets = [0, 0, 0], sizes = [8, 8, 8], strides = [1, 1, 1]} : vector<8x8x16xf32> to vector<8x8x8xf32>
      %77 = arith.mulf %75, %76 : vector<8x8x8xf32>
      %cst_25 = arith.constant dense<0.000000e+00> : vector<8x8xf32>
      %78 = vector.multi_reduction <add>, %77, %cst_25 [1] : vector<8x8x8xf32> to vector<8x8xf32>
      %79 = arith.mulf %75, %75 : vector<8x8x8xf32>
      %cst_26 = arith.constant dense<0.000000e+00> : vector<8x8xf32>
      %80 = vector.multi_reduction <add>, %79, %cst_26 [1] : vector<8x8x8xf32> to vector<8x8xf32>
      %81 = arith.mulf %76, %76 : vector<8x8x8xf32>
      %cst_27 = arith.constant dense<0.000000e+00> : vector<8x8xf32>
      %82 = vector.multi_reduction <add>, %81, %cst_27 [1] : vector<8x8x8xf32> to vector<8x8xf32>
      %cst_28 = arith.constant 9.99999993E-9 : f32
      %cst_29 = arith.constant 9.99999993E-9 : f32
      %83 = arith.mulf %cst_28, %cst_29 : f32
      %84 = vector.broadcast %83 : f32 to vector<8x8xf32>
      %85 = arith.maximumf %80, %84 : vector<8x8xf32>
      %86 = math.rsqrt %85 : vector<8x8xf32>
      %87 = arith.mulf %78, %86 : vector<8x8xf32>
      %88 = vector.broadcast %83 : f32 to vector<8x8xf32>
      %89 = arith.maximumf %82, %88 : vector<8x8xf32>
      %90 = math.rsqrt %89 : vector<8x8xf32>
      %91 = arith.mulf %87, %90 : vector<8x8xf32>
      %92 = vector.shape_cast %91 : vector<8x8xf32> to vector<1x8x8xf32>
      %cst_30 = arith.constant dense<0.000000e+00> : vector<1xf32>
      %93 = vector.multi_reduction <add>, %92, %cst_30 [1, 2] : vector<1x8x8xf32> to vector<1xf32>
      %94 = vector.shape_cast %93 : vector<1xf32> to vector<1x1x1xf32>
      %95 = vector.extract %94[0, 0, 0] : f32 from vector<1x1x1xf32>
      %96 = tpu.iota {dimensions = array<i32: 1>} : vector<1x8x128xi32>
      %c0_i32_31 = arith.constant 0 : i32
      %97 = vector.broadcast %c0_i32_31 : i32 to vector<1x8x128xi32>
      %98 = arith.cmpi eq, %96, %97 : vector<1x8x128xi32>
      %c0_32 = arith.constant 0 : index
      %99 = memref.load %arg8[%c0_32] : memref<2xf32, #tpu.memory_space<smem>>
      %c1_i32_33 = arith.constant 1 : i32
      %100 = vector.broadcast %c1_i32_33 : i32 to vector<1x8x128xi32>
      %101 = arith.cmpi eq, %96, %100 : vector<1x8x128xi32>
      %c1_34 = arith.constant 1 : index
      %102 = memref.load %arg8[%c1_34] : memref<2xf32, #tpu.memory_space<smem>>
      %103 = vector.broadcast %102 : f32 to vector<1x8x128xf32>
      %104 = vector.broadcast %95 : f32 to vector<1x8x128xf32>
      %105 = arith.select %101, %103, %104 : vector<1x8x128xi1>, vector<1x8x128xf32>
      %106 = vector.broadcast %99 : f32 to vector<1x8x128xf32>
      %107 = arith.select %98, %106, %105 : vector<1x8x128xi1>, vector<1x8x128xf32>
      %c0_35 = arith.constant 0 : index
      %c0_36 = arith.constant 0 : index
      %c0_37 = arith.constant 0 : index
      %108 = vector.load %arg7[%c0_35, %c0_36, %c0_37] : memref<1x8x128xf32, #tpu.memory_space<vmem>>, vector<1x8x128xf32>
      tpu.vector_store %arg7[%c0_35, %c0_36, %c0_37], %107 {strides = array<i32>} : memref<1x8x128xf32, #tpu.memory_space<vmem>>, vector<1x8x128xf32>,
    } else {
    }
    return
  }
  func.func @transform_0(%arg0: i32, %arg1: i32) -> (i32, i32) {
    %c1_i32 = arith.constant 1 : i32
    %0 = arith.muli %arg0, %c1_i32 : i32
    %1 = arith.addi %0, %arg1 : i32
    %c0_i32 = arith.constant 0 : i32
    %2 = arith.minsi %1, %c0_i32 : i32
    %c0_i32_0 = arith.constant 0 : i32
    %c0_i32_1 = arith.constant 0 : i32
    return %2, %c0_i32_0 : i32, i32
  }
  func.func @transform_1(%arg0: i32, %arg1: i32) -> (i32, i32) {
    %c1_i32 = arith.constant 1 : i32
    %0 = arith.muli %arg0, %c1_i32 : i32
    %1 = arith.addi %0, %arg1 : i32
    %c0_i32 = arith.constant 0 : i32
    %2 = arith.minsi %1, %c0_i32 : i32
    %c0_i32_0 = arith.constant 0 : i32
    %c0_i32_1 = arith.constant 0 : i32
    return %2, %c0_i32_0 : i32, i32
  }
  func.func @transform_2(%arg0: i32, %arg1: i32) -> (i32, i32) {
    %c1_i32 = arith.constant 1 : i32
    %0 = arith.muli %arg0, %c1_i32 : i32
    %1 = arith.addi %0, %arg1 : i32
    %c0_i32 = arith.constant 0 : i32
    %2 = arith.minsi %1, %c0_i32 : i32
    %c0_i32_0 = arith.constant 0 : i32
    %c0_i32_1 = arith.constant 0 : i32
    return %2, %c0_i32_0 : i32, i32
  }
  func.func @transform_3(%arg0: i32, %arg1: i32) -> (i32, i32, i32) {
    %c0_i32 = arith.constant 0 : i32
    %c0_i32_0 = arith.constant 0 : i32
    %c0_i32_1 = arith.constant 0 : i32
    %c0_i32_2 = arith.constant 0 : i32
    return %c0_i32, %c0_i32_0, %c0_i32_1 : i32, i32, i32
  }
  func.func @transform_4(%arg0: i32, %arg1: i32) -> (i32, i32, i32) {
    %c0_i32 = arith.constant 0 : i32
    %c0_i32_0 = arith.constant 0 : i32
    %c0_i32_1 = arith.constant 0 : i32
    %c0_i32_2 = arith.constant 0 : i32
    return %c0_i32, %c0_i32_0, %c0_i32_1 : i32, i32, i32
  }
  func.func @transform_5(%arg0: i32, %arg1: i32) -> (i32, i32, i32) {
    %c0_i32 = arith.constant 0 : i32
    %c0_i32_0 = arith.constant 0 : i32
    %c0_i32_1 = arith.constant 0 : i32
    return %arg0, %c0_i32, %c0_i32_0 : i32, i32, i32
  }
}

</mosaic_0001>

<bundles_post_ra>
// kernel: tpu_custom_call.1
= control target key start
LH: loop header
LB: loop body
LE: loop exit
PB: predicated region body
PF: predicated region fallthrough
CT: control target
= control target key end

     0   :  { %s1873_s0 = inlined_call_operand.hbm [shape: f32[4,128], index: 0, kind: input, shape index: {}]   ;;  %s1874_s1 = inlined_call_operand.hbm [shape: f32[4,128], index: 1, kind: input, shape index: {}]   ;;  %s1875_s2 = inlined_call_operand.hbm [shape: f32[4,4], index: 2, kind: input, shape index: {}]   ;;  %s1876_s3 = inlined_call_operand.hbm [shape: f32[8,8,16], index: 3, kind: input, shape index: {}]   ;;  %s1877_s4 = inlined_call_operand.hbm [shape: f32[8,8,16], index: 4, kind: input, shape index: {}]   ;;  %s1878_s5 = inlined_call_operand.hbm [shape: f32[2,8,128], index: 5, kind: output, shape index: {}]  }
   0x1   :  { %1890 = sst [smem:[#allocation20_spill]] %s1874_s1 }
   0x2   :  { %1891 = sst [smem:[#allocation21_spill]] %s1876_s3 }
   0x3   :  { %10 = vsyncpa [#allocation4], 0 }
   0x4   :  { %12 = vsyncpa [#allocation4 + $0x1], 0 }
   0x5   :  { %13 = vsyncpa [#allocation7], 0 }
   0x6   :  { %15 = vsyncpa [#allocation7 + $0x1], 0 }
   0x7   :  { %16 = vsyncpa [#allocation10], 0 }
   0x8   :  { %17 = vsyncpa [#allocation5], 0 }
   0x9   :  { %19 = vsyncpa [#allocation5 + $0x1], 0  ;;  %s1537_s18 = smov 0   ;;  %s1539_s19 = smov 0  }
   0xa   :  { %s1541_s20 = smov 0   ;;  %s1543_s21 = smov 0  }
   0xb   :  { %s1545_s22 = smov 0   ;;  %s1547_s23 = smov 0  }
   0xc   :  { %s1549_s24 = smov 0   ;;  %s1551_s25 = smov 0  }
   0xd LB: > { %1892 = sst [smem:[#allocation17_spill]] %s1484_s24  ;;  %s1576_s26 = sadd.s32 4294967295, %s1488_s25   ;;  %s1488_s25 = sphi %s1551_s25, %s25_s25   ;;  %s1484_s24 = sphi %s1549_s24, %s1917_s24   ;;  %s1480_s23 = sphi %s1547_s23, %s1916_s23   ;;  %s1476_s22 = sphi %s1545_s22, %s1863_s22   ;;  %s1472_s21 = sphi %s1543_s21, %s1921_s21   ;;  %s1468_s20 = sphi %s1541_s20, %s1920_s20   ;;  %s1464_s19 = sphi %s1539_s19, %s1919_s19   ;;  %s1460_s18 = sphi %s1537_s18, %s1918_s18  }
   0xe   : > { %s1041_s27 = sadd.s32 4294967294, %s1488_s25   ;;  %p63_p0 = scmp.ne.s32.totalorder %s1476_s22, %s1472_s21 }
   0xf   : > { %p1881_p1 = scmp.eq.s32.totalorder %s1576_s26, 0  ;;  %s182_s28 = sadd.s32 1, %s1468_s20 }
  0x10   : > { %p192_p2 = scmp.ne.s32.totalorder %s1468_s20, %s1464_s19  ;;  %p193_p4 = scmp.eq.s32.totalorder %s1576_s26, 1 }
  0x11   : > { %p1586_p3 = por %p1881_p1, %p63_p0  ;;  %p198_p5 = scmp.ne.s32.totalorder %s1464_s19, %s1460_s18 }
  0x12   : > { %p199_p6 = scmp.eq.s32.totalorder %s1041_s27, 1  ;;  %p1593_p7 = por %p193_p4, %p192_p2 }
  0x13   : > { %s1893_s29 = scalar_select %p1586_p3, 1, 0 }
  0x14   : > { %s1894_s30 = scalar_select %p1593_p7, 1, 0 }
  0x15   : > { %p1042_p8 = scmp.ge.s32.totalorder %s1488_s25, 1  ;;  %p1598_p9 = por %p199_p6, %p198_p5 }
  0x16   : > { %p206_p10 = scmp.lt.s32.totalorder %s1488_s25, 3  ;;  %s1490_s8 = smov [#allocation9]  }
  0x17   : > { %s1895_s6 = scalar_select %p1598_p9, 1, 0 }
  0x18   : > { %p1603_p11 = pnand %p1042_p8, %p206_p10  ;;  %s218_s9 = sshll.u32 %s1490_s8, 4  ;;  %s219_s9 = int_to_ptr.vmem [resolvable:$true] %s218_s9 }
  0x19   : > { %s37_s11 = sadd.s32 1, %s1484_s24  ;;  %s1254_s12 = scalar_lea.vmem %s219_s9, 1024 }
  0x1a   : > { %s1896_s7 = scalar_select %p1603_p11, 1, 0 }
  0x1b   : > { %p1094_p12 = pneg %p1603_p11  ;;  %p1255_p4 = scmp.ne.s32.totalorder %s219_s9, %s1254_s12 }
  0x1c   : > { %p1262_p8 = scmp.lt.s32.totalorder %s219_s9, %s219_s9  ;;  %p1263_p10 = scmp.lt.s32.totalorder %s1254_s12, %s1254_s12 }
  0x1d   : > { %p1612_p0 = pnand %p1094_p12, %p1881_p1 }
  0x1e   : > { %p1264_p9 = por %p1263_p10, %p1262_p8 }
  0x1f   : > { %s1897_s10 = scalar_select %p1612_p0, 1, 0 }
  0x20   : > { %p1882_p2 = pneg %p1612_p0 }
  0x22   : > { %p1257_p5 = pnand %p1255_p4, %p1882_p2 }
  0x24   : > { %p1258_p6 = pneg %p1257_p5 }
  0x26   : > { %p1265_p13 = pnand %p1264_p9, %p1258_p6 }
  0x28   : > { %1268 = shalt.err (!%p1265_p13)
}
  0x29   : > { %s1879_s13 = smov 128   ;;  %s1880_s14 = smov 8  }
  0x2a   : > { %s1898_s3 = sld [smem:[#allocation21_spill]]  ;;  %p39_p9 = scmp.ge.s32.totalorder %s37_s11, 2 }
  0x2b   : > { %p1457_p12 = scmp.ne.s32.totalorder %s1476_s22, 0  ;;  %p58_p13 = scmp.eq.s32.totalorder %s1488_s25, 0 }
  0x2c   : > { %s1923_s11 = smov (%p39_p9, %s37_s11), 0  ;;  %p1117_p4 = scmp.lt.s32.totalorder %s1488_s25, 2 }
  0x2d   : > { %1899 = sst [smem:[#allocation18_spill]] %s1923_s11  ;;  %s179_s17 = ssub.s32 %s1484_s24, %s1923_s11 }
  0x2e   : > { %p59_p5 = por %p1457_p12, %p58_p13  ;;  %p180_p6 = scmp.eq.s32.totalorder %s179_s17, 0 }
  0x2f   : > { %s266_s8 = sand.u32 1, %s1488_s25   ;;  %s1902_s1 = sld [smem:[#allocation20_spill]] }
  0x30   : > { %1097 = dma.hbm_to_vmem [thread:$0]  (!%p1612_p0), %s1898_s3, 1024, %s219_s9, [#allocation10], %s1879_s13, %s1879_s13, %s1880_s14  }
  0x31   : > { %s1640_s21 = scalar_select %p180_p6, %s1468_s20, %s182_s28  }
  0x32   : > { %p1642_p8 = pnand %p1117_p4, %p59_p5  ;;  %s1493_s9 = smov [#allocation6]  }
  0x33   : > { %1900 = sst [smem:[#allocation19_spill]] %s1640_s21  ;;  %s280_s12 = sshll.u32 %s1493_s9, 4  ;;  %s281_s12 = int_to_ptr.vmem [resolvable:$true] %s280_s12 }
  0x34   : > { %s1647_s15 = scalar_lea.sflag [#allocation7], %s266_s8  ;;  %p1657_p9 = pneg %p1642_p8 }
  0x35   : > { %s1269_s14 = scalar_lea.hbm %s1902_s1, 64 }
  0x36   : > { %p1270_p10 = scmp.ne.s32.totalorder %s1902_s1, %s1269_s14  ;;  %p1276_p4 = scmp.lt.s32.totalorder %s1269_s14, %s1269_s14 }
  0x38   : > { %p1272_p12 = pnand %p1657_p9, %p1270_p10 }
  0x3a   : > { %p1273_p13 = pneg %p1272_p12 }
  0x3c   : > { %p1278_p5 = pnand %p1276_p4, %p1273_p13 }
  0x3e   : > { %1281 = shalt.err (!%p1278_p5)
}
  0x3f   : > { %s1282_s8 = scalar_lea.vmem %s281_s12, 64  ;;  %s1289_s3 = scalar_lea.vmem %s281_s12, 128 }
  0x40   : > { %p1283_p6 = scmp.ne.s32.totalorder %s281_s12, %s1282_s8  ;;  %p1290_p7 = scmp.lt.s32.totalorder %s281_s12, %s281_s12 }
  0x41   : > { %p1291_p3 = scmp.lt.s32.totalorder %s1289_s3, %s1282_s8 }
  0x42   : > { %p1285_p1 = pnand %p1283_p6, %p1657_p9 }
  0x43   : > { %p1292_p11 = por %p1291_p3, %p1290_p7 }
  0x44   : > { %p1286_p2 = pneg %p1285_p1 }
  0x46   : > { %p1293_p0 = pnand %p1292_p11, %p1286_p2 }
  0x48   : > { %1296 = shalt.err (!%p1293_p0)
}
  0x49   : > { %1107 = dma.hbm_to_vmem [thread:$0]  (!%p1642_p8), %s1902_s1, 64, %s281_s12, %s1647_s15  }
  0x4a   : > { %s1494_s14 = smov [#allocation11]   ;;  %p1904_p1 = scmp.ne.s32.totalorder %s1897_s10, 0 }
  0x4b   : > { %s231_s16 = sshll.u32 %s1494_s14, 4  ;;  %s232_s16 = int_to_ptr.vmem [resolvable:$true] %s231_s16 }
  0x4c   : > { %s1308_s17 = scalar_lea.vmem %s232_s16, 1024  ;;  %p1905_p12 = pneg %p1904_p1 }
  0x4d   : > { %p1309_p10 = scmp.ne.s32.totalorder %s232_s16, %s1308_s17  ;;  %p1316_p3 = scmp.lt.s32.totalorder %s232_s16, %s232_s16 }
  0x4e   : > { %p1317_p7 = scmp.lt.s32.totalorder %s1308_s17, %s1308_s17 }
  0x4f   : > { %p1311_p13 = pnand %p1309_p10, %p1905_p12 }
  0x50   : > { %p1318_p11 = por %p1317_p7, %p1316_p3 }
  0x51   : > { %p1312_p4 = pneg %p1311_p13 }
  0x53   : > { %p1319_p0 = pnand %p1318_p11, %p1312_p4 }
  0x55   : > { %1322 = shalt.err (!%p1319_p0)
}
  0x56   : > { %s1906_s8 = smov 8   ;;  %s1907_s3 = smov 128  }
  0x57   : > { %1100 = dma.hbm_to_vmem [thread:$0]  (!%p1904_p1), %s1877_s4, 1024, %s232_s16, [#allocation10], %s1907_s3, %s1907_s3, %s1906_s8  }
  0x58   : > { %s1495_s9 = smov [#allocation3]   ;;  %s1323_s17 = scalar_lea.hbm %s1873_s0, 64 }
  0x59   : > { %s259_s14 = sshll.u32 %s1495_s9, 4  ;;  %p1324_p2 = scmp.ne.s32.totalorder %s1873_s0, %s1323_s17  ;;  %s260_s14 = int_to_ptr.vmem [resolvable:$true] %s259_s14 }
  0x5a   : > { %p1330_p10 = scmp.lt.s32.totalorder %s1323_s17, %s1323_s17 }
  0x5b   : > { %p1326_p5 = pnand %p1324_p2, %p1657_p9 }
  0x5d   : > { %p1327_p6 = pneg %p1326_p5 }
  0x5f   : > { %p1332_p12 = pnand %p1330_p10, %p1327_p6 }
  0x61   : > { %1335 = shalt.err (!%p1332_p12)
}
  0x62   : > { %s1336_s10 = scalar_lea.vmem %s260_s14, 64  ;;  %s1343_s16 = scalar_lea.vmem %s260_s14, 128 }
  0x63   : > { %p1337_p1 = scmp.ne.s32.totalorder %s260_s14, %s1336_s10  ;;  %p1344_p3 = scmp.lt.s32.totalorder %s260_s14, %s260_s14 }
  0x64   : > { %p1345_p7 = scmp.lt.s32.totalorder %s1343_s16, %s1336_s10 }
  0x65   : > { %p1339_p13 = pnand %p1337_p1, %p1657_p9 }
  0x66   : > { %p1346_p11 = por %p1345_p7, %p1344_p3 }
  0x67   : > { %p1340_p4 = pneg %p1339_p13 }
  0x69   : > { %p1347_p0 = pnand %p1346_p11, %p1340_p4 }
  0x6b   : > { %1350 = shalt.err (!%p1347_p0)
}
  0x6c   : > { %1104 = dma.hbm_to_vmem [thread:$0]  (!%p1642_p8), %s1873_s0, 64, %s260_s14, [#allocation4]  }
  0x6d   : > { %s1496_s11 = smov [#allocation8]   ;;  %s1351_s12 = scalar_lea.hbm %s1875_s2, 64 }
  0x6e   : > { %s301_s21 = sshll.u32 %s1496_s11, 4  ;;  %p1352_p2 = scmp.ne.s32.totalorder %s1875_s2, %s1351_s12  ;;  %s302_s21 = int_to_ptr.vmem [resolvable:$true] %s301_s21 }
  0x6f   : > { %p1358_p10 = scmp.lt.s32.totalorder %s1351_s12, %s1351_s12 }
  0x70   : > { %p1354_p5 = pnand %p1352_p2, %p1657_p9 }
  0x72   : > { %p1355_p6 = pneg %p1354_p5 }
  0x74   : > { %p1360_p12 = pnand %p1358_p10, %p1355_p6 }
  0x76   : > { %1363 = shalt.err (!%p1360_p12)
}
  0x77   : > { %s1364_s17 = scalar_lea.vmem %s302_s21, 64  ;;  %s1371_s14 = scalar_lea.vmem %s302_s21, 128 }
  0x78   : > { %p1365_p1 = scmp.ne.s32.totalorder %s302_s21, %s1364_s17  ;;  %p1372_p3 = scmp.lt.s32.totalorder %s302_s21, %s302_s21 }
  0x79   : > { %p1373_p7 = scmp.lt.s32.totalorder %s1371_s14, %s1364_s17 }
  0x7a   : > { %p1367_p13 = pnand %p1365_p1, %p1657_p9 }
  0x7b   : > { %p1374_p11 = por %p1373_p7, %p1372_p3 }
  0x7c   : > { %p1368_p4 = pneg %p1367_p13 }
  0x7e   : > { %p1375_p0 = pnand %p1374_p11, %p1368_p4 }
  0x80   : > { %1378 = shalt.err (!%p1375_p0)
}
  0x81   : > { %1110 = dma.hbm_to_vmem [thread:$0]  (!%p1642_p8), %s1875_s2, 64, %s302_s21, %s1647_s15  }
  0x82   : > { %p1908_p2 = scmp.ne.s32.totalorder %s1896_s7, 0 }
  0x83   : > { %s312_s28 = sand.u32 (!%p1908_p2), 1, %s1476_s22   ;;  %p1909_p9 = scmp.ne.s32.totalorder (!%p1908_p2), %s1893_s29, 0 }
  0x84   : > { %310 = sbr.rel (%p1908_p2) target bundleno = 646 (0x286), region = 40  ;;  %s1716_s1 = sshll.u32 (!%p1908_p2), %s312_s28, 2 }
  0x85   : > { %s313_s24 = scalar_lea.sflag (!%p1908_p2), [#allocation4], %s312_s28  ;;  %s316_s11 = scalar_lea.vmem (!%p1908_p2), [#allocation3], %s1716_s1 }
  0x89   : > { %1442 = dma.done.wait (%p1909_p9), %s313_s24, 64  }
  0x8a   : > { %1444 = vsyncadd (%p1909_p9), %s313_s24, 4294967232  ;;  %s321_s27 = sand.u32 1, %s1576_s26   ;;  %s325_s7 = scalar_lea.vmem [#allocation6], %s1716_s1 }
  0x8b   : > { %s322_s15 = scalar_lea.sflag [#allocation7], %s321_s27 }
  0x8c   : > { %1446 = dma.done.wait (%p1909_p9), %s322_s15, 128  }
  0x8d   : > { %1448 = vsyncadd (%p1909_p9), %s322_s15, 4294967168  ;;  %s334_s21 = scalar_lea.vmem [#allocation8], %s1716_s1  ;;  %p1910_p8 = scmp.eq.s32.totalorder %s1576_s26, 0 }
  0x8f   : > { %1450 = dma.done.wait (%p1910_p8), [#allocation10], 2048   ;;  %p1911_p5 = pmov %p1910_p8 }
  0x90   : > { %v1497_v0 = vmov 2   ;;  %v1498_v1 = vmov 1   ;;  %v403_v2 = vlaneseq  ;;  %s1059_s8 = sshll.u32 %s1480_s23, 2  ;;  %v521_v5 = vld [vmem:[#allocation11 + $0x8] sm:$0xff]  ;;  %vm697_vm0 = vcmask 64512   ;;  %v520_v6 = vld [vmem:[#allocation11] sm:$0xff] }
  0x91   : > { %1452 = vsyncadd (%p1911_p5), [#allocation10], 4294965248  ;;  %1207 = vset.pattern.permute.xlu1 %v1497_v0  ;;  %1206 = vset.pattern.permute.xlu0 %v1498_v1  ;;  %v405_v4 = vstv %s1059_s8  ;;  %v522_v7 = vld [vmem:[#allocation11 + $0x10] sm:$0xff]  ;;  %s1499_s29 = smov 8   ;;  %v690_v8 = vmul.f32 %v521_v5, %v521_v5  ;;  %v689_v9 = vmul.f32 %v520_v6, %v520_v6  ;;  %v523_v11 = vld [vmem:[#allocation11 + $0x18] sm:$0xff]  ;;  %vm568_vm2 = vcmask 130112  }
  0x92   : > { %v1735_v3 = vshrl.u32 %v403_v2, 7  ;;  %538 = vrot.lane.b32.xlu0 %v521_v5, %s1499_s29  ;;  %536 = vrot.lane.b32.xlu1 %v520_v6, %s1499_s29  ;;  %v691_v10 = vmul.f32 %v522_v7, %v522_v7  ;;  %v524_v12 = vld [vmem:[#allocation11 + $0x20] sm:$0xff]  ;;  %v525_v13 = vld [vmem:[#allocation11 + $0x28] sm:$0xff]  ;;  %v692_v14 = vmul.f32 %v523_v11, %v523_v11  ;;  %v526_v17 = vld [vmem:[#allocation11 + $0x30] sm:$0xff]  ;;  %s1502_s26 = smov 96   ;;  %s1503_s3 = smov 64  }
  0x93   : > { %v693_v15 = vmul.f32 %v524_v12, %v524_v12  ;;  %v694_v16 = vmul.f32 %v525_v13, %v525_v13  ;;  %v705_v19 = vsel %vm697_vm0, %v690_v8, 0.0  ;;  %v698_v20 = vsel %vm697_vm0, %v689_v9, 0.0  ;;  %v527_v35 = vld [vmem:[#allocation11 + $0x38] sm:$0xff]  ;;  %s1504_s12 = smov 32   ;;  %s1505_s13 = smov 120  }
  0x94   : > { %v1740_v18 = vadd.s32 %v405_v4, %v1735_v3  ;;  %v712_v21 = vsel %vm697_vm0, %v691_v10, 0.0  ;;  %v695_v22 = vmul.f32 %v526_v17, %v526_v17  ;;  %v706_v23 = vrot.slane %v705_v19, 4  ;;  %v398_v8 = vld [vmem:[%s334_s21] sm:$0xf]  ;;  %s376_s17 = sand.u32 1, %s1464_s19   ;;  %s1063_s15 = sshll.u32 %s1480_s23, 7 }
  0x95   : > { %v699_v24 = vrot.slane %v698_v20, 4  ;;  %v713_v25 = vrot.slane %v712_v21, 4  ;;  %v719_v26 = vsel %vm697_vm0, %v692_v14, 0.0  ;;  %v726_v28 = vsel %vm697_vm0, %v693_v15, 0.0  ;;  %s1058_s16 = sshll.u32 %s376_s17, 3  ;;  %p1912_p10 = scmp.ne.s32.totalorder %s1894_s30, 0 }
  0x96   : > { %540 = vrot.lane.b32.xlu0 %v522_v7, %s1499_s29  ;;  %v720_v27 = vrot.slane %v719_v26, 4  ;;  %542 = vrot.lane.b32.xlu1 %v523_v11, %s1499_s29  ;;  %v733_v29 = vsel %vm697_vm0, %v694_v16, 0.0  ;;  %v740_v30 = vsel %vm697_vm0, %v695_v22, 0.0  ;;  %v707_v31 = vadd.f32 %v706_v23, %v705_v19 }
  0x97   : > { %v700_v32 = vadd.f32 %v699_v24, %v698_v20  ;;  %v714_v33 = vadd.f32 %v713_v25, %v712_v21  ;;  %v727_v34 = vrot.slane %v726_v28, 4  ;;  %v734_v37 = vrot.slane %v733_v29, 4 }
  0x98   : > { %v721_v36 = vadd.f32 %v720_v27, %v719_v26  ;;  %v741_v38 = vrot.slane %v740_v30, 4  ;;  %v696_v39 = vmul.f32 %v527_v35, %v527_v35  ;;  %v708_v40 = vrot.slane %v707_v31, 2 }
  0x99   : > { %v701_v41 = vrot.slane %v700_v32, 2  ;;  %v715_v42 = vrot.slane %v714_v33, 2  ;;  %v728_v43 = vadd.f32 %v727_v34, %v726_v28  ;;  %v735_v45 = vadd.f32 %v734_v37, %v733_v29 }
  0x9a   : > { %v722_v44 = vrot.slane %v721_v36, 2  ;;  %544 = vrot.lane.b32.xlu0 %v524_v12, %s1499_s29  ;;  %546 = vrot.lane.b32.xlu1 %v525_v13, %s1499_s29  ;;  %v742_v46 = vadd.f32 %v741_v38, %v740_v30  ;;  %v747_v47 = vsel %vm697_vm0, %v696_v39, 0.0  ;;  %v709_v48 = vadd.f32 %v708_v40, %v707_v31  ;;  %v514_v38 = vld [vmem:[#allocation9 + $0x10] sm:$0xff]  ;;  %v515_v39 = vld [vmem:[#allocation9 + $0x18] sm:$0xff] }
  0x9b   : > { %v702_v49 = vadd.f32 %v701_v41, %v700_v32  ;;  %v716_v50 = vadd.f32 %v715_v42, %v714_v33  ;;  %v729_v51 = vrot.slane %v728_v43, 2  ;;  %v736_v53 = vrot.slane %v735_v45, 2  ;;  %v512_v41 = vld [vmem:[#allocation9] sm:$0xff] }
  0x9c   : > { %v723_v52 = vadd.f32 %v722_v44, %v721_v36  ;;  %v743_v54 = vrot.slane %v742_v46, 2  ;;  %v748_v55 = vrot.slane %v747_v47, 4  ;;  %v710_v56 = vrot.slane %v709_v48, 1  ;;  %v513_v36 = vld [vmem:[#allocation9 + $0x8] sm:$0xff] }
  0x9d   : > { %v703_v57 = vrot.slane %v702_v49, 1  ;;  %v717_v58 = vrot.slane %v716_v50, 1  ;;  %v730_v59 = vadd.f32 %v729_v51, %v728_v43  ;;  %v737_v61 = vadd.f32 %v736_v53, %v735_v45  ;;  %v1780_v51 = vld [vmem:[#allocation9 + $0x30] sm:$0xff] }
  0x9e   : > { %v724_v60 = vrot.slane %v723_v52, 1  ;;  %v744_v62 = vadd.f32 %v743_v54, %v742_v46  ;;  %548 = vrot.lane.b32.xlu0 %v526_v17, %s1499_s29  ;;  %v749_v63 = vadd.f32 %v748_v55, %v747_v47  ;;  %550 = vrot.lane.b32.xlu1 %v527_v35, %s1499_s29  ;;  %v711_v0 = vadd.f32 %v710_v56, %v709_v48  ;;  %v516_v46 = vld [vmem:[#allocation9 + $0x20] sm:$0xff]  ;;  %v1777_v48 = vld [vmem:[#allocation9 + $0x28] sm:$0xff] }
  0x9f   : > { %v704_v1 = vadd.f32 %v703_v57, %v702_v49  ;;  %v718_v2 = vadd.f32 %v717_v58, %v716_v50  ;;  %v731_v4 = vrot.slane %v730_v59, 1  ;;  %v738_v6 = vrot.slane %v737_v61, 1 }
  0xa0   : > { %v725_v5 = vadd.f32 %v724_v60, %v723_v52  ;;  %v750_v7 = vrot.slane %v749_v63, 2  ;;  %vm407_vm1 = vcmp.lt.s32.totalorder %v1740_v18, 4  ;;  %v779_v9 = vmax.f32 %v711_v0, 1e-16  ;;  %v1788_v60 = vld [vmem:[#allocation9 + $0x38] sm:$0xff] }
  0xa1   : > { %v778_v10 = vmax.f32 %v704_v1, 1e-16  ;;  %v780_v11 = vmax.f32 %v718_v2, 1e-16  ;;  %v739_v12 = vadd.f32 %v738_v6, %v737_v61  ;;  %v745_v13 = vrot.slane %v744_v62, 1 }
  0xa2   : > { %v751_v14 = vadd.f32 %v750_v7, %v749_v63  ;;  %1211 = vrsqrt.f32 %v779_v9  ;;  %v781_v15 = vmax.f32 %v725_v5, 1e-16  ;;  %v732_v16 = vadd.f32 %v731_v4, %v730_v59 }
  0xa3   : > { %v1761_v17 = vsel %vm407_vm1, %v398_v8, 0.0  ;;  %1213 = vrsqrt.f32 %v778_v10  ;;  %v783_v20 = vmax.f32 %v739_v12, 1e-16  ;;  %v746_v23 = vadd.f32 %v745_v13, %v744_v62 }
  0xa4   : > { %v752_v19 = vrot.slane %v751_v14, 1  ;;  %451 = vperm.xlu1 %1207, %v1761_v17   ;;  %431 = vperm.xlu0 %1206, %v1761_v17   ;;  %1215 = vrsqrt.f32 %v780_v11  ;;  %v782_v22 = vmax.f32 %v732_v16, 1e-16  ;;  %v1500_v24 = vmov 3  }
  0xa5   : > { %1217 = vrsqrt.f32 %v781_v15  ;;  %v784_v26 = vmax.f32 %v746_v23, 1e-16  ;;  %v1501_v33 = vmov 0   ;;  %v626_v37 = vmul.f32 %v513_v36, %v513_v36 }
  0xa6   : > { %v753_v21 = vadd.f32 %v752_v19, %v751_v14  ;;  %1219 = vrsqrt.f32 %v783_v20  ;;  %v627_v42 = vmul.f32 %v514_v38, %v514_v38  ;;  %v628_v43 = vmul.f32 %v515_v39, %v515_v39 }
  0xa7   : > { %1221 = vrsqrt.f32 %v782_v22  ;;  %v640_v40 = vsel %vm568_vm2, %v626_v37, 0.0  ;;  %v625_v45 = vmul.f32 %v512_v41, %v512_v41  ;;  %v629_v50 = vmul.f32 %v516_v46, %v516_v46 }
  0xa8   : > { %1208 = vset.pattern.permute.xlu1 %v1500_v24  ;;  %v785_v25 = vmax.f32 %v753_v21, 1e-16  ;;  %1209 = vset.pattern.permute.xlu0 %v1501_v33  ;;  %v641_v44 = vrot.slane %v640_v40, 4  ;;  %v647_v47 = vsel %vm568_vm2, %v627_v42, 0.0  ;;  %v654_v49 = vsel %vm568_vm2, %v628_v43, 0.0 }
  0xa9   : > { %471 = vperm.xlu1 %1208, %v1761_v17   ;;  %v633_v53 = vsel %vm568_vm2, %v625_v45, 0.0  ;;  %v648_v54 = vrot.slane %v647_v47, 4  ;;  %v630_v55 = vmul.f32 %v1777_v48, %v1777_v48  ;;  %v655_v56 = vrot.slane %v654_v49, 4 }
  0xaa   : > { %1223 = vrsqrt.f32 %v785_v25  ;;  %v642_v52 = vadd.f32 %v641_v44, %v640_v40  ;;  %v631_v57 = vmul.f32 %v1780_v51, %v1780_v51  ;;  %v634_v58 = vrot.slane %v633_v53, 4 }
  0xab   : > { %1225 = vrsqrt.f32 %v784_v26  ;;  %v661_v59 = vsel %vm568_vm2, %v629_v50, 0.0  ;;  %v649_v62 = vadd.f32 %v648_v54, %v647_v47  ;;  %v668_v63 = vsel %vm568_vm2, %v630_v55, 0.0 }
  0xac   : > { %v643_v61 = vrot.slane %v642_v52, 2  ;;  %v656_v0 = vadd.f32 %v655_v56, %v654_v49  ;;  %v662_v1 = vrot.slane %v661_v59, 4  ;;  %v675_v2 = vsel %vm568_vm2, %v631_v57, 0.0 }
  0xad   : > { %v632_v4 = vmul.f32 %v1788_v60, %v1788_v60  ;;  %v635_v5 = vadd.f32 %v634_v58, %v633_v53  ;;  %v669_v7 = vrot.slane %v668_v63, 4  ;;  %v650_v8 = vrot.slane %v649_v62, 2 }
  0xae   : > { %v644_v6 = vadd.f32 %v643_v61, %v642_v52  ;;  %v676_v9 = vrot.slane %v675_v2, 4  ;;  %v657_v10 = vrot.slane %v656_v0, 2  ;;  %v663_v11 = vadd.f32 %v662_v1, %v661_v59 }
  0xaf   : > { %v1212_v27 = vpop.eup %1211  ;;  %v682_v12 = vsel %vm568_vm2, %v632_v4, 0.0  ;;  %v636_v15 = vrot.slane %v635_v5, 2  ;;  %v670_v19 = vadd.f32 %v669_v7, %v668_v63  ;;  %v651_v20 = vadd.f32 %v650_v8, %v649_v62  ;;  %v396_v4 = vld [vmem:[%s316_s11] sm:$0xf]  ;;  %v397_v8 = vld [vmem:[%s325_s7] sm:$0xf] }
  0xb0   : > { %v1214_v28 = vpop.eup %1213  ;;  %804 = vrot.lane.b32.xlu1 %v1212_v27, %s1499_s29  ;;  %v645_v16 = vrot.slane %v644_v6, 1  ;;  %v677_v21 = vadd.f32 %v676_v9, %v675_v2  ;;  %v683_v22 = vrot.slane %v682_v12, 4  ;;  %v658_v23 = vadd.f32 %v657_v10, %v656_v0  ;;  %s378_s7 = scalar_lea.vmem [#allocation12], %s1058_s16 }
  0xb1   : > { %v1216_v29 = vpop.eup %1215  ;;  %v637_v26 = vadd.f32 %v636_v15, %v635_v5  ;;  %vm843_vm3 = vcmask 1041409   ;;  %vm846_vm4 = vcmask 1042434   ;;  %vm849_vm5 = vcmask 1043459   ;;  %s900_s21 = sshll.u32 %s378_s7, 4  ;;  %s901_s21 = int_to_ptr.vmem [resolvable:$true] %s900_s21 }
  0xb2   : > { %806 = vrot.lane.b32.xlu0 %v1216_v29, %s1499_s29  ;;  %v1218_v30 = vpop.eup %1217  ;;  %v646_v29 = vadd.f32 %v645_v16, %v644_v6  ;;  %v659_v37 = vrot.slane %v658_v23, 1  ;;  %vm852_vm6 = vcmask 1044484   ;;  %vm855_vm7 = vcmask 1045509   ;;  %s1379_s23 = scalar_lea.vmem %s901_s21, 128 }
  0xb3   : > { %v1220_v31 = vpop.eup %1219  ;;  %v638_v44 = vrot.slane %v637_v26, 1  ;;  %vm858_vm8 = vcmask 1046534   ;;  %vm861_vm9 = vcmask 1047559   ;;  %vm418_vm10 = vcmask 257024   ;;  %p1380_p6 = scmp.ne.s32.totalorder %s901_s21, %s1379_s23 }
  0xb4   : > { %802 = vrot.lane.b32.xlu1 %v1214_v28, %s1499_s29  ;;  %v1222_v32 = vpop.eup %1221  ;;  %v755_v49 = vmax.f32 %v646_v29, 1e-16  ;;  %v660_v56 = vadd.f32 %v659_v37, %v658_v23  ;;  %vm495_vm11 = vcmask 27648   ;;  %vm878_vm12 = vcmp.eq.s32.totalorder %v1735_v3, 1 }
  0xb5   : > { %v639_v58 = vadd.f32 %v638_v44, %v637_v26  ;;  %vm876_vm13 = vcmp.eq.s32.totalorder %v1735_v3, 0  ;;  %p1381_p12 = pnand %p1380_p6, %p1912_p10 }
  0xb6   : > { %808 = vrot.lane.b32.xlu0 %v1218_v30, %s1499_s29  ;;  %1227 = vrsqrt.f32 %v755_v49 }
  0xb7   : > { %v1224_v34 = vpop.eup %1223  ;;  %p1382_p1 = pneg %p1381_p12 }
  0xb8   : > { %812 = vrot.lane.b32.xlu1 %v1220_v31, %s1499_s29  ;;  %v1226_v35 = vpop.eup %1225  ;;  %v671_v31 = vrot.slane %v670_v19, 2 }
  0xba   : > { %810 = vrot.lane.b32.xlu0 %v1222_v32, %s1499_s29  ;;  %v652_v32 = vrot.slane %v651_v20, 1  ;;  %v672_v52 = vadd.f32 %v671_v31, %v670_v19 }
  0xbc   : > { %816 = vrot.lane.b32.xlu1 %v1224_v34, %s1499_s29  ;;  %v678_v34 = vrot.slane %v677_v21, 2  ;;  %v653_v53 = vadd.f32 %v652_v32, %v651_v20  ;;  %v673_v0 = vrot.slane %v672_v52, 1  ;;  %v399_v20 = vsub.f32 %v396_v4, %v397_v8 }
  0xbe   : > { %814 = vrot.lane.b32.xlu0 %v1226_v35, %s1499_s29  ;;  %v684_v35 = vadd.f32 %v683_v22, %v682_v12  ;;  %v756_v5 = vmax.f32 %v653_v53, 1e-16  ;;  %v674_v16 = vadd.f32 %v673_v0, %v672_v52 }
  0xc0   : > { %v685_v54 = vrot.slane %v684_v35, 2  ;;  %1229 = vrsqrt.f32 %v756_v5 }
  0xc2   : > { %414 = vperm.xlu0 %1209, %v1761_v17   ;;  %v686_v7 = vadd.f32 %v685_v54, %v684_v35 }
  0xc3   : > { %v1228_v52 = vpop.eup %1227 }
  0xc4   : > { %v687_v23 = vrot.slane %v686_v7, 1 }
  0xc6   : > { %1210 = vset.pattern.permute.xlu0 %v1500_v24  ;;  %v664_v24 = vrot.slane %v663_v11, 2  ;;  %v688_v35 = vadd.f32 %v687_v23, %v686_v7 }
  0xc8   : > { %v665_v40 = vadd.f32 %v664_v24, %v663_v11  ;;  %v757_v11 = vmax.f32 %v660_v56, 1e-16 }
  0xca   : > { %v666_v57 = vrot.slane %v665_v40, 1  ;;  %1231 = vrsqrt.f32 %v757_v11 }
  0xcd   : > { %v1230_v18 = vpop.eup %1229 }
 0x104   : > { %v539_v13 = vpop.permute.xlu0 %538  ;;  %v537_v14 = vpop.permute.xlu1 %536 }
 0x105   : > { %v561_v25 = vmul.f32 %v539_v13, %v513_v36  ;;  %v560_v43 = vmul.f32 %v537_v14, %v512_v41 }
 0x107   : > { %v576_v42 = vsel %vm568_vm2, %v561_v25, 0.0  ;;  %v569_v41 = vsel %vm568_vm2, %v560_v43, 0.0 }
 0x108   : > { %v541_v27 = vpop.permute.xlu0 %540  ;;  %v543_v28 = vpop.permute.xlu1 %542  ;;  %v577_v55 = vrot.slane %v576_v42, 4  ;;  %v570_v10 = vrot.slane %v569_v41, 4 }
 0x109   : > { %v562_v30 = vmul.f32 %v541_v27, %v514_v38  ;;  %v563_v33 = vmul.f32 %v543_v28, %v515_v39  ;;  %v679_v39 = vadd.f32 %v678_v34, %v677_v21  ;;  %v754_v21 = vmax.f32 %v639_v58, 1e-16 }
 0x10a   : > { %v578_v9 = vadd.f32 %v577_v55, %v576_v42  ;;  %v571_v25 = vadd.f32 %v570_v10, %v569_v41  ;;  %v1232_v10 = vpop.eup %1231 }
 0x10b   : > { %v583_v36 = vsel %vm568_vm2, %v562_v30, 0.0  ;;  %v590_v38 = vsel %vm568_vm2, %v563_v33, 0.0  ;;  %v680_v6 = vrot.slane %v679_v39, 1  ;;  %v400_v33 = vmul.f32 %v399_v20, %v399_v20 }
 0x10c   : > { %v545_v45 = vpop.permute.xlu0 %544  ;;  %v547_v47 = vpop.permute.xlu1 %546  ;;  %v584_v59 = vrot.slane %v583_v36, 4  ;;  %v591_v63 = vrot.slane %v590_v38, 4  ;;  %v579_v24 = vrot.slane %v578_v9, 2  ;;  %1233 = vrsqrt.f32 %v754_v21 }
 0x10d   : > { %v564_v50 = vmul.f32 %v545_v45, %v516_v46  ;;  %v565_v61 = vmul.f32 %v547_v47, %v1777_v48  ;;  %v667_v48 = vadd.f32 %v666_v57, %v665_v40  ;;  %v681_v22 = vadd.f32 %v680_v6, %v679_v39 }
 0x10e   : > { %v585_v12 = vadd.f32 %v584_v59, %v583_v36  ;;  %v580_v37 = vadd.f32 %v579_v24, %v578_v9  ;;  %v572_v40 = vrot.slane %v571_v25, 2  ;;  %v1812_v36 = vsel %vm407_vm1, %v400_v33, 0.0 }
 0x10f   : > { %v597_v46 = vsel %vm568_vm2, %v564_v50, 0.0  ;;  %v604_v14 = vsel %vm568_vm2, %v565_v61, 0.0  ;;  %v758_v26 = vmax.f32 %v667_v48, 1e-16  ;;  %v760_v34 = vmax.f32 %v681_v22, 1e-16 }
 0x110   : > { %v549_v62 = vpop.permute.xlu0 %548  ;;  %v551_v2 = vpop.permute.xlu1 %550  ;;  %v598_v13 = vrot.slane %v597_v46, 4  ;;  %v605_v27 = vrot.slane %v604_v14, 4  ;;  %v586_v28 = vrot.slane %v585_v12, 2  ;;  %v761_v50 = vmax.f32 %v688_v35, 1e-16 }
 0x111   : > { %v566_v1 = vmul.f32 %v549_v62, %v1780_v51  ;;  %v567_v15 = vmul.f32 %v551_v2, %v1788_v60  ;;  %v592_v51 = vadd.f32 %v591_v63, %v590_v38  ;;  %v759_v60 = vmax.f32 %v674_v16, 1e-16 }
 0x112   : > { %v599_v29 = vadd.f32 %v598_v13, %v597_v46  ;;  %v606_v42 = vadd.f32 %v605_v27, %v604_v14  ;;  %v587_v44 = vadd.f32 %v586_v28, %v585_v12  ;;  %1235 = vrsqrt.f32 %v758_v26 }
 0x113   : > { %v611_v19 = vsel %vm568_vm2, %v566_v1, 0.0  ;;  %v618_v31 = vsel %vm568_vm2, %v567_v15, 0.0  ;;  %v593_v32 = vrot.slane %v592_v51, 2  ;;  %1237 = vrsqrt.f32 %v759_v60 }
 0x114   : > { %v612_v30 = vrot.slane %v611_v19, 4  ;;  %v619_v43 = vrot.slane %v618_v31, 4  ;;  %v600_v45 = vrot.slane %v599_v29, 2  ;;  %1239 = vrsqrt.f32 %v760_v34 }
 0x115   : > { %v594_v49 = vadd.f32 %v593_v32, %v592_v51  ;;  %v573_v53 = vadd.f32 %v572_v40, %v571_v25  ;;  %v607_v38 = vrot.slane %v606_v42, 2  ;;  %v581_v56 = vrot.slane %v580_v37, 1 }
 0x116   : > { %v613_v47 = vadd.f32 %v612_v30, %v611_v19  ;;  %v620_v39 = vadd.f32 %v619_v43, %v618_v31  ;;  %v601_v57 = vadd.f32 %v600_v45, %v599_v29  ;;  %v588_v59 = vrot.slane %v587_v44, 1 }
 0x117   : > { %v595_v61 = vrot.slane %v594_v49, 1  ;;  %1241 = vrsqrt.f32 %v761_v50  ;;  %v608_v62 = vadd.f32 %v607_v38, %v606_v42  ;;  %v582_v46 = vadd.f32 %v581_v56, %v580_v37 }
 0x118   : > { %v614_v41 = vrot.slane %v613_v47, 2  ;;  %v621_v63 = vrot.slane %v620_v39, 2  ;;  %v574_v0 = vrot.slane %v573_v53, 1  ;;  %v589_v5 = vadd.f32 %v588_v59, %v587_v44 }
 0x119   : > { %v602_v6 = vrot.slane %v601_v57, 1  ;;  %v596_v9 = vadd.f32 %v595_v61, %v594_v49  ;;  %v1234_v11 = vpop.eup %1233  ;;  %v771_v12 = vmul.f32 %v1228_v52, %v582_v46  ;;  %v609_v14 = vrot.slane %v608_v62, 1 }
 0x11a   : > { %v615_v1 = vadd.f32 %v614_v41, %v613_v47  ;;  %v622_v48 = vadd.f32 %v621_v63, %v620_v39  ;;  %v575_v13 = vadd.f32 %v574_v0, %v573_v53  ;;  %v772_v15 = vmul.f32 %v1230_v18, %v589_v5 }
 0x11b   : > { %v603_v16 = vadd.f32 %v602_v6, %v601_v57  ;;  %v773_v22 = vmul.f32 %v1232_v10, %v596_v9  ;;  %v610_v29 = vadd.f32 %v609_v14, %v608_v62  ;;  %v496_v6 = vsel %vm495_vm11, %v1761_v17, 0.0 }
 0x11c   : > { %v616_v19 = vrot.slane %v615_v1, 1  ;;  %v770_v28 = vmul.f32 %v1234_v11, %v575_v13  ;;  %v623_v30 = vrot.slane %v622_v48, 1 }
 0x11e   : > { %v617_v60 = vadd.f32 %v616_v19, %v615_v1  ;;  %v624_v47 = vadd.f32 %v623_v30, %v622_v48 }
 0x11f   : > { %v452_v54 = vpop.permute.xlu1 %451  ;;  %v432_v55 = vpop.permute.xlu0 %431 }
 0x120   : > { %v434_v58 = vmul.f32 %v432_v55, %v1812_v36  ;;  %v454_v2 = vmul.f32 %v452_v54, %v1812_v36  ;;  %v1236_v20 = vpop.eup %1235 }
 0x121   : > { %v1238_v24 = vpop.eup %1237  ;;  %v774_v32 = vmul.f32 %v1236_v20, %v603_v16 }
 0x122   : > { %436 = vrot.lane.b32.xlu1 %v434_v58, %s1502_s26  ;;  %v1240_v26 = vpop.eup %1239  ;;  %v775_v45 = vmul.f32 %v1238_v24, %v610_v29 }
 0x123   : > { %v776_v53 = vmul.f32 %v1240_v26, %v617_v60 }
 0x124   : > { %v472_v4 = vpop.permute.xlu1 %471  ;;  %v807_v8 = vpop.permute.xlu0 %806 }
 0x125   : > { %v474_v7 = vmul.f32 %v472_v4, %v1812_v36  ;;  %v828_v25 = vmul.f32 %v807_v8, %v772_v15  ;;  %v1242_v42 = vpop.eup %1241 }
 0x126   : > { %456 = vrot.lane.b32.xlu1 %v454_v2, %s1503_s3  ;;  %v777_v57 = vmul.f32 %v1242_v42, %v624_v47  ;;  %s1827_s3 = scalar_lea.hbm %s1878_s5, %s1063_s15 }
 0x127   : > { %476 = vrot.lane.b32.xlu0 %v474_v7, %s1504_s12  ;;  %v845_v37 = vrot.slane %v828_v25, 6  ;;  %s887_s12 = scalar_lea.sflag [#allocation5], %s376_s17 }
 0x128   : > { %v805_v51 = vpop.permute.xlu1 %804  ;;  %v809_v23 = vpop.permute.xlu0 %808 }
 0x129   : > { %v827_v21 = vmul.f32 %v805_v51, %v771_v12  ;;  %v829_v27 = vmul.f32 %v809_v23, %v773_v22 }
 0x12b   : > { %v842_v33 = vrot.slane %v827_v21, 7  ;;  %v848_v43 = vrot.slane %v829_v27, 5 }
 0x12c   : > { %v803_v31 = vpop.permute.xlu1 %802  ;;  %v811_v35 = vpop.permute.xlu0 %810 }
 0x12d   : > { %v826_v34 = vmul.f32 %v803_v31, %v770_v28  ;;  %v830_v40 = vmul.f32 %v811_v35, %v774_v32 }
 0x12f   : > { %v844_v44 = vsel %vm843_vm3, %v842_v33, %v826_v34  ;;  %v851_v50 = vrot.slane %v830_v40, 4 }
 0x130   : > { %v847_v49 = vsel %vm846_vm4, %v845_v37, %v844_v44  ;;  %v813_v52 = vpop.permute.xlu1 %812  ;;  %v815_v54 = vpop.permute.xlu0 %814 }
 0x131   : > { %v850_v38 = vsel %vm849_vm5, %v848_v43, %v847_v49  ;;  %v831_v39 = vmul.f32 %v813_v52, %v775_v45  ;;  %v832_v55 = vmul.f32 %v815_v54, %v776_v53 }
 0x132   : > { %v853_v41 = vsel %vm852_vm6, %v851_v50, %v850_v38 }
 0x133   : > { %v854_v56 = vrot.slane %v831_v39, 3  ;;  %v857_v58 = vrot.slane %v832_v55, 2 }
 0x134   : > { %v817_v59 = vpop.permute.xlu1 %816 }
 0x135   : > { %v856_v61 = vsel %vm855_vm7, %v854_v56, %v853_v41  ;;  %v833_v18 = vmul.f32 %v817_v59, %v777_v57 }
 0x136   : > { %v859_v63 = vsel %vm858_vm8, %v857_v58, %v856_v61 }
 0x137   : > { %v860_v62 = vrot.slane %v833_v18, 1 }
 0x139   : > { %v862_v46 = vsel %vm861_vm9, %v860_v62, %v859_v63 }
 0x13a   : > { %863 = vrot.lane.b32.xlu1 %v862_v46, %s1505_s13  ;;  %s1506_s13 = smov [#allocation12]  }
 0x13d   : > { %v415_v0 = vpop.permute.xlu0 %414 }
 0x13e   : > { %v417_v1 = vmul.f32 %v415_v0, %v1812_v36 }
 0x140   : > { %v419_v2 = vsel %vm418_vm10, %v417_v1, 0.0 }
 0x146   : > { %420 = vadd.xlane.f32.xlu0 %v419_v2 }
 0x194   : > { %v437_v4 = vpop.permute.xlu1 %436 }
 0x195   : > { %v439_v5 = vsel %vm418_vm10, %v437_v4, 0.0 }
 0x196   : > { %440 = vadd.xlane.f32.xlu1 %v439_v5 }
 0x198   : > { %v457_v7 = vpop.permute.xlu1 %456 }
 0x199   : > { %v459_v8 = vsel %vm418_vm10, %v457_v7, 0.0  ;;  %v477_v9 = vpop.permute.xlu0 %476 }
 0x19a   : > { %460 = vadd.xlane.f32.xlu0 %v459_v8  ;;  %497 = vadd.xlane.f32.xlu1 %v496_v6  ;;  %v479_v10 = vsel %vm418_vm10, %v477_v9, 0.0 }
 0x19e   : > { %480 = vadd.xlane.f32.xlu0 %v479_v10 }
 0x1ac   : > { %v864_v11 = vpop.permute.xlu1 %863 }
 0x1ad   : > { %v866_v48 = vsel %vm697_vm0, %v864_v11, 0.0 }
 0x1ae   : > { %867 = vadd.xlane.f32.xlu0 %v866_v48 }
 0x1cf   : > { %v421_v36 = vpop.xlane.xlu0 %420 }
 0x1d0   : > { %v422_v12 = vrot.slane %v421_v36, 4 }
 0x1d2   : > { %v423_v13 = vadd.f32 %v422_v12, %v421_v36 }
 0x1d4   : > { %v424_v14 = vrot.slane %v423_v13, 2 }
 0x1d6   : > { %v425_v15 = vadd.f32 %v424_v14, %v423_v13 }
 0x1d8   : > { %v426_v51 = vrot.slane %v425_v15, 1 }
 0x1da   : > { %v427_v16 = vadd.f32 %v426_v51, %v425_v15 }
 0x1dc   : > { %1066 = vpush %v427_v16 }
 0x20d   : > { %s1067_s9 = spop %1066 }
 0x21f   : > { %v441_v17 = vpop.xlane.xlu1 %440 }
 0x220   : > { %v442_v19 = vrot.slane %v441_v17, 4 }
 0x222   : > { %v443_v20 = vadd.f32 %v442_v19, %v441_v17 }
 0x223   : > { %v461_v21 = vpop.xlane.xlu0 %460  ;;  %v498_v22 = vpop.xlane.xlu1 %497 }
 0x224   : > { %v444_v23 = vrot.slane %v443_v20, 2  ;;  %v462_v24 = vrot.slane %v461_v21, 4  ;;  %v499_v25 = vrot.slane %v498_v22, 4 }
 0x226   : > { %v463_v26 = vadd.f32 %v462_v24, %v461_v21  ;;  %v445_v27 = vadd.f32 %v444_v23, %v443_v20  ;;  %v500_v28 = vadd.f32 %v499_v25, %v498_v22 }
 0x227   : > { %v481_v29 = vpop.xlane.xlu0 %480 }
 0x228   : > { %v464_v30 = vrot.slane %v463_v26, 2  ;;  %v482_v31 = vrot.slane %v481_v29, 4  ;;  %v446_v32 = vrot.slane %v445_v27, 1  ;;  %v501_v60 = vrot.slane %v500_v28, 2 }
 0x22a   : > { %v483_v33 = vadd.f32 %v482_v31, %v481_v29  ;;  %v447_v34 = vadd.f32 %v446_v32, %v445_v27  ;;  %v465_v35 = vadd.f32 %v464_v30, %v463_v26  ;;  %v502_v37 = vadd.f32 %v501_v60, %v500_v28 }
 0x22c   : > { %v484_v40 = vrot.slane %v483_v33, 2  ;;  %1068 = vpush %v447_v34  ;;  %v466_v42 = vrot.slane %v465_v35, 1  ;;  %v503_v43 = vrot.slane %v502_v37, 1 }
 0x22e   : > { %v467_v44 = vadd.f32 %v466_v42, %v465_v35  ;;  %v485_v45 = vadd.f32 %v484_v40, %v483_v33  ;;  %v504_v49 = vadd.f32 %v503_v43, %v502_v37 }
 0x230   : > { %1070 = vpush %v467_v44  ;;  %v486_v47 = vrot.slane %v485_v45, 1 }
 0x232   : > { %v487_v50 = vadd.f32 %v486_v47, %v485_v45 }
 0x234   : > { %1072 = vpush %v487_v50 }
 0x235   : > { %1074 = vpush %v504_v49 }
 0x237   : > { %v868_v52 = vpop.xlane.xlu0 %867 }
 0x238   : > { %v869_v53 = vrot.slane %v868_v52, 4 }
 0x23a   : > { %v870_v38 = vadd.f32 %v869_v53, %v868_v52 }
 0x23c   : > { %v871_v39 = vrot.slane %v870_v38, 2 }
 0x23e   : > { %v872_v54 = vadd.f32 %v871_v39, %v870_v38 }
 0x240   : > { %v873_v55 = vrot.slane %v872_v54, 1 }
 0x242   : > { %v874_v56 = vadd.f32 %v873_v55, %v872_v54 }
 0x244   : > { %1076 = vpush %v874_v56 }
 0x25d   : > { %s1069_s14 = spop %1068 }
 0x25e   : > { %s449_s28 = sadd.f32 %s1069_s14, %s1067_s9  ;;  %s1383_s9 = sshll.u32 %s1506_s13, 4  ;;  %s1384_s9 = int_to_ptr.vmem [resolvable:$false] %s1383_s9 }
 0x25f   : > { %s1385_s14 = scalar_lea.vmem %s1384_s9, 256  ;;  %p1386_p13 = scmp.lt.s32.totalorder %s901_s21, %s1384_s9 }
 0x260   : > { %p1387_p4 = scmp.lt.s32.totalorder %s1385_s14, %s1379_s23 }
 0x261   : > { %s1071_s10 = spop %1070 }
 0x262   : > { %s469_s24 = sadd.f32 %s1071_s10, %s449_s28  ;;  %p1388_p3 = por %p1387_p4, %p1386_p13 }
 0x264   : > { %p1389_p7 = pnand %p1388_p3, %p1382_p1 }
 0x265   : > { %s1073_s1 = spop %1072 }
 0x266   : > { %s489_s11 = sadd.f32 %s1073_s1, %s469_s24  ;;  %s1075_s27 = spop %1074 }
 0x267   : > { %v880_v57 = vstv %s1075_s27 }
 0x268   : > { %v883_v58 = vstv %s489_s11 }
 0x275   : > { %s1077_s8 = spop %1076 }
 0x276   : > { %v881_v41 = vstv %s1077_s8 }
 0x277   : > { %v882_v59 = vsel %vm878_vm12, %v880_v57, %v881_v41 }
 0x278   : > { %v884_v61 = vsel %vm876_vm13, %v883_v58, %v882_v59 }
 0x279   : > { %885 = vst [vmem:[%s378_s7] sm:$0xff] %v884_v61 }
 0x27a   : > { %1392 = shalt.err (!%p1389_p7)
}
 0x27b   : > { %s1393_s10 = scalar_lea.hbm %s1827_s3, 128  ;;  %s1397_s28 = scalar_lea.hbm %s1878_s5, 256 }
 0x27c   : > { %p1394_p11 = scmp.ne.s32.totalorder %s1827_s3, %s1393_s10  ;;  %p1398_p9 = scmp.lt.s32.totalorder %s1827_s3, %s1878_s5 }
 0x27d   : > { %p1399_p8 = scmp.lt.s32.totalorder %s1397_s28, %s1393_s10 }
 0x27e   : > { %p1395_p0 = pnand %p1394_p11, %p1912_p10 }
 0x27f   : > { %p1400_p5 = por %p1399_p8, %p1398_p9 }
 0x280   : > { %p1396_p2 = pneg %p1395_p0 }
 0x282   : > { %p1401_p6 = pnand %p1400_p5, %p1396_p2 }
 0x284   : > { %1404 = shalt.err (!%p1401_p6)
}
 0x285   : > { %1092 = dma.vmem_to_hbm [thread:$0]  (%p1912_p10), %s901_s21, 128, %s1827_s3, %s887_s12  }
 0x286 PF: > { %s912_s11 = sand.u32 1, %s1460_s18   ;;  %p1913_p12 = scmp.ne.s32.totalorder %s1895_s6, 0 }
 0x287   : > { %p1914_p1 = scmp.ge.s32.totalorder %s1488_s25, 2  ;;  %s913_s27 = scalar_lea.sflag [#allocation5], %s912_s11 }
 0x289   : > { %p1112_p13 = pnand %p1914_p1, %p1913_p12 }
 0x28b   : > { %p1113_p4 = pneg %p1112_p13 }
 0x28d   : > { %1454 = dma.done.wait (%p1113_p4), %s913_s27, 128  }
 0x28e   : > { %1456 = vsyncadd (%p1113_p4), %s913_s27, 4294967168  ;;  %s25_s25 = sadd.s32 1, %s1488_s25   ;;  %s1915_s30 = sld [smem:[#allocation19_spill]] }
 0x28f   : > { %p22_p3 = scmp.ge.s32.totalorder %s25_s25, 4   ;;  %s1916_s23 = sld [smem:[#allocation17_spill]] }
 0x290   : > { %s1917_s24 = sld [smem:[#allocation18_spill]]  ;;  %s1918_s18 = smov %s1464_s19 }
 0x291   : > { %s1919_s19 = smov %s1468_s20  ;;  %s1921_s21 = smov %s1476_s22 }
 0x292   : > { %s1863_s22 = smov 0   ;;  %24 = sbr.rel (!%p22_p3) target bundleno = 13 (0xd), region = 129 }
 0x294   : > { %s1920_s20 = smov %s1915_s30 }
 0x297   :  { %918 = vsyncpa [#allocation4], 1 }
 0x298   :  { %920 = vsyncpa [#allocation4 + $0x1], 1 }
 0x299   :  { %921 = vsyncpa [#allocation7], 1 }
 0x29a   :  { %923 = vsyncpa [#allocation7 + $0x1], 1 }
 0x29b   :  { %924 = vsyncpa [#allocation10], 1 }
 0x29c   :  { %925 = vsyncpa [#allocation5], 1 }
 0x29d   :  { %927 = vsyncpa [#allocation5 + $0x1], 1 }

</bundles_post_ra>
